<compile_context>
chip_gen: v6e
topology: v6e:2x2x1
jax: 0.10.0
libtpu: 0.0.40
codegen_flags: <defaults>
</compile_context>

<pallas_src>
import math

import jax
import jax.numpy as jnp
from jax.experimental import pallas as pl
from jax.experimental.pallas import tpu as pltpu


def _mosaic_kernel(img_ref, cfa_ref, out_ref):
    """img_ref: (C, TR, L); cfa_ref: (C, 1, L); out_ref: (TR, L)."""
    acc = img_ref[0] * cfa_ref[0]                   # (TR, L) * (1, L) broadcast
    for ch in range(1, img_ref.shape[0]):           # unrolled at trace time (C=3)
        acc = acc + img_ref[ch] * cfa_ref[ch]
    out_ref[...] = acc


def _round_up(x, m):
    return -(-x // m) * m


def _pick_layout(h, w, k, channels, itemsize, tile_budget_bytes, batch):
    """Flatten (H, W) -> (rows, L) and pick the per-step row tile TR.

    L is the smallest multiple of the CFA period k*W that is also a multiple
    of 128 (lane-dense, unmasked vst on every generation).  rows are padded up
    to a multiple of TR; TR is a multiple of 8, sized to ~tile_budget_bytes of
    image tile, and small enough that the grid keeps >= ~4 parallel steps so
    both v7x TensorCores get work.
    """
    s = h * w
    period = k * w                                       # CFA period, flat axis
    L = period * (128 // math.gcd(period, 128))          # lane-dense width

    rows = -(-s // L)                                    # ceil(s / L)

    # Budget-bound TR (multiple of 8).
    tr_budget = max(8, (tile_budget_bytes // (channels * L * itemsize)) // 8 * 8)
    # Split-bound TR: keep total grid steps (B * row_tiles) around >= 4.
    desired_row_tiles = max(1, -(-4 // batch))
    if rows // desired_row_tiles >= 8:
        tr_split = (rows // desired_row_tiles) // 8 * 8
    else:
        tr_split = 8                                     # can't split further
    tr = min(tr_budget, tr_split, _round_up(rows, 8))

    rows_pad = _round_up(rows, tr)
    return L, rows_pad, tr


def mosaic_cfa_bias_forward(img, cfa_param, bias_param, kernel_size=2,
                            tile_budget_bytes=8 << 20):
    """img: [B, 3, H, W] f32; cfa_param: [1, 3, k, k]; bias_param: [1, 1, k, k]."""
    b, c, h, w = img.shape
    k = kernel_size
    assert h % k == 0 and w % k == 0
    assert cfa_param.shape == (1, c, k, k)
    assert bias_param.shape == (1, 1, k, k)

    # Repeated parameters returned by the module (plain XLA tiles; bias is
    # returned but never added to the output -- identical to the PyTorch module).
    reps = (1, 1, h // k, w // k)
    cfa_tiled = jnp.tile(cfa_param, reps)      # [1, 3, H, W]
    bias_tiled = jnp.tile(bias_param, reps)    # [1, 1, H, W]

    itemsize = jnp.dtype(img.dtype).itemsize
    L, rows_pad, tr = _pick_layout(h, w, k, c, itemsize, tile_budget_bytes, b)

    # Flatten spatial dims and zero-pad so (rows_pad, L) tiles exactly with
    # lane-dense stores.  Padding is a no-op in the common aligned case.
    s = h * w
    s_pad = rows_pad * L
    img_flat = img.reshape(b, c, s)
    if s_pad != s:
        img_flat = jnp.pad(img_flat, ((0, 0), (0, 0), (0, s_pad - s)))
    img_r = img_flat.reshape(b, c, rows_pad, L)

    # Resident CFA lane band (3, 1, L): band[ch, 0, q] = cfa[ch, (q//W)%k, (q%W)%k].
    # Valid because L % (k*W) == 0, so every row of the flattened view sees the
    # same lane pattern.
    band = jnp.tile(cfa_param[0], (1, 1, w // k)).reshape(c, k * w)   # (3, k*W)
    cfa_band = jnp.tile(band, (1, L // (k * w))).reshape(c, 1, L)     # (3, 1, L)

    # Scoped-VMEM request: double-buffered img + out tiles plus the band, with
    # 2x headroom.  Explicit limit so v5e's 16 MiB default doesn't bite; cap
    # well below v7x's 64 MiB physical VMEM.
    tile_bytes = (2 * (c + 1) * tr * L + 2 * c * L) * itemsize
    vmem_limit = int(min(56 << 20, max(2 * tile_bytes, 16 << 20)))

    grid = (b, rows_pad // tr)
    out = pl.pallas_call(
        _mosaic_kernel,
        out_shape=jax.ShapeDtypeStruct((b, 1, rows_pad, L), img.dtype),
        grid_spec=pltpu.PrefetchScalarGridSpec(
            num_scalar_prefetch=0,
            grid=grid,
            in_specs=[
                # Image tile: batch dim squeezed, full channel dim, spatial tile.
                pl.BlockSpec((None, c, tr, L), lambda bi, ri: (bi, 0, ri, 0)),
                # CFA band: constant block index -> resident in VMEM, fetched once.
                pl.BlockSpec((c, 1, L), lambda bi, ri: (0, 0, 0)),
            ],
            out_specs=pl.BlockSpec((None, None, tr, L),
                                   lambda bi, ri: (bi, 0, ri, 0)),
        ),
        compiler_params=pltpu.CompilerParams(
            dimension_semantics=("parallel", "parallel"),
            vmem_limit_bytes=vmem_limit,
        ),
    )(img_r, cfa_band)

    out = out.reshape(b, 1, s_pad)
    if s_pad != s:
        out = out[:, :, :s]
    out = out.reshape(b, 1, h, w)
    return out, cfa_tiled, bias_tiled


if __name__ == "__main__":
    key = jax.random.PRNGKey(0)
    k_img, k_cfa, k_bias = jax.random.split(key, 3)

    kernel_size = 2
    B, C, H, W = 2, 3, 16, 16  # module implies 3 input channels

    img = jax.random.normal(k_img, (B, C, H, W), dtype=jnp.float32)
    # Deterministic synthetic parameters (module shapes; not loaded from disk).
    cfa_param = jax.random.normal(k_cfa, (1, 3, kernel_size, kernel_size),
                                  dtype=jnp.float32)
    bias_param = jax.random.normal(k_bias, (1, 1, kernel_size, kernel_size),
                                   dtype=jnp.float32)

    fwd = jax.jit(mosaic_cfa_bias_forward,
                  static_argnames=("kernel_size", "tile_budget_bytes"))
    out, cfa_tiled, bias_tiled = fwd(img, cfa_param, bias_param,
                                     kernel_size=kernel_size)
    jax.block_until_ready((out, cfa_tiled, bias_tiled))

    # Reference check in plain JAX.
    reps = (1, 1, H // kernel_size, W // kernel_size)
    cfa_ref_t = jnp.tile(cfa_param, reps)
    bias_ref_t = jnp.tile(bias_param, reps)
    out_ref = jnp.sum(img * cfa_ref_t, axis=1, keepdims=True)

    assert out.shape == (B, 1, H, W)
    assert cfa_tiled.shape == (1, 3, H, W)
    assert bias_tiled.shape == (1, 1, H, W)
    assert jnp.allclose(out, out_ref, atol=1e-5, rtol=1e-5)
    assert jnp.allclose(cfa_tiled, cfa_ref_t)
    assert jnp.allclose(bias_tiled, bias_ref_t)

    print("KERNEL_OK")
</pallas_src>

<mosaic_0001>
module attributes {stable_mosaic.version = 11 : i64} {
  func.func @_mosaic_kernel(%arg0: i32, %arg1: i32, %arg2: memref<1x3x8x128xf32, #tpu.memory_space<vmem>>, %arg3: memref<3x1x128xf32, #tpu.memory_space<vmem>>, %arg4: memref<1x1x8x128xf32, #tpu.memory_space<vmem>>) attributes {dimension_semantics = [#tpu.dimension_semantics<parallel>, #tpu.dimension_semantics<parallel>], iteration_bounds = array<i64: 2, 1>, scalar_prefetch = 0 : i64, scratch_operands = 0 : i64, tpu.core_type = #tpu.core_type<tc>, window_params = [{transform_indices = @transform_0, window_bounds = array<i64: 1, 3, 8, 128>}, {pipeline_mode = #tpu.pipeline_mode<synchronous>, transform_indices = @transform_1, window_bounds = array<i64: 3, 1, 128>}, {transform_indices = @transform_2, window_bounds = array<i64: 1, 1, 8, 128>}]} {
    %c0 = arith.constant 0 : index
    %c0_0 = arith.constant 0 : index
    %c0_1 = arith.constant 0 : index
    %c0_2 = arith.constant 0 : index
    %0 = vector.load %arg2[%c0, %c0_0, %c0_1, %c0_2] : memref<1x3x8x128xf32, #tpu.memory_space<vmem>>, vector<1x1x8x128xf32>
    %1 = vector.shape_cast %0 : vector<1x1x8x128xf32> to vector<8x128xf32>
    %c0_3 = arith.constant 0 : index
    %c0_4 = arith.constant 0 : index
    %c0_5 = arith.constant 0 : index
    %2 = vector.load %arg3[%c0_3, %c0_4, %c0_5] : memref<3x1x128xf32, #tpu.memory_space<vmem>>, vector<1x1x128xf32>
    %3 = vector.shape_cast %2 : vector<1x1x128xf32> to vector<1x128xf32>
    %4 = vector.broadcast %3 : vector<1x128xf32> to vector<8x128xf32>
    %5 = arith.mulf %1, %4 : vector<8x128xf32>
    %c0_6 = arith.constant 0 : index
    %c1 = arith.constant 1 : index
    %c0_7 = arith.constant 0 : index
    %c0_8 = arith.constant 0 : index
    %6 = vector.load %arg2[%c0_6, %c1, %c0_7, %c0_8] : memref<1x3x8x128xf32, #tpu.memory_space<vmem>>, vector<1x1x8x128xf32>
    %7 = vector.shape_cast %6 : vector<1x1x8x128xf32> to vector<8x128xf32>
    %c1_9 = arith.constant 1 : index
    %c0_10 = arith.constant 0 : index
    %c0_11 = arith.constant 0 : index
    %8 = vector.load %arg3[%c1_9, %c0_10, %c0_11] : memref<3x1x128xf32, #tpu.memory_space<vmem>>, vector<1x1x128xf32>
    %9 = vector.shape_cast %8 : vector<1x1x128xf32> to vector<1x128xf32>
    %10 = vector.broadcast %9 : vector<1x128xf32> to vector<8x128xf32>
    %11 = arith.mulf %7, %10 : vector<8x128xf32>
    %12 = arith.addf %5, %11 : vector<8x128xf32>
    %c0_12 = arith.constant 0 : index
    %c2 = arith.constant 2 : index
    %c0_13 = arith.constant 0 : index
    %c0_14 = arith.constant 0 : index
    %13 = vector.load %arg2[%c0_12, %c2, %c0_13, %c0_14] : memref<1x3x8x128xf32, #tpu.memory_space<vmem>>, vector<1x1x8x128xf32>
    %14 = vector.shape_cast %13 : vector<1x1x8x128xf32> to vector<8x128xf32>
    %c2_15 = arith.constant 2 : index
    %c0_16 = arith.constant 0 : index
    %c0_17 = arith.constant 0 : index
    %15 = vector.load %arg3[%c2_15, %c0_16, %c0_17] : memref<3x1x128xf32, #tpu.memory_space<vmem>>, vector<1x1x128xf32>
    %16 = vector.shape_cast %15 : vector<1x1x128xf32> to vector<1x128xf32>
    %17 = vector.broadcast %16 : vector<1x128xf32> to vector<8x128xf32>
    %18 = arith.mulf %14, %17 : vector<8x128xf32>
    %19 = arith.addf %12, %18 : vector<8x128xf32>
    %c0_18 = arith.constant 0 : index
    %c0_19 = arith.constant 0 : index
    %c0_20 = arith.constant 0 : index
    %c0_21 = arith.constant 0 : index
    %20 = vector.load %arg4[%c0_18, %c0_19, %c0_20, %c0_21] : memref<1x1x8x128xf32, #tpu.memory_space<vmem>>, vector<1x1x8x128xf32>
    %21 = vector.shape_cast %20 : vector<1x1x8x128xf32> to vector<8x128xf32>
    %22 = vector.shape_cast %19 : vector<8x128xf32> to vector<1x1x8x128xf32>
    tpu.vector_store %arg4[%c0_18, %c0_19, %c0_20, %c0_21], %22 {strides = array<i32>} : memref<1x1x8x128xf32, #tpu.memory_space<vmem>>, vector<1x1x8x128xf32>,
    return
  }
  func.func @transform_0(%arg0: i32, %arg1: i32) -> (i32, i32, i32, i32) {
    %c0_i32 = arith.constant 0 : i32
    %c0_i32_0 = arith.constant 0 : i32
    %c0_i32_1 = arith.constant 0 : i32
    return %arg0, %c0_i32, %arg1, %c0_i32_0 : i32, i32, i32, i32
  }
  func.func @transform_1(%arg0: i32, %arg1: i32) -> (i32, i32, i32) {
    %c0_i32 = arith.constant 0 : i32
    %c0_i32_0 = arith.constant 0 : i32
    %c0_i32_1 = arith.constant 0 : i32
    %c0_i32_2 = arith.constant 0 : i32
    return %c0_i32, %c0_i32_0, %c0_i32_1 : i32, i32, i32
  }
  func.func @transform_2(%arg0: i32, %arg1: i32) -> (i32, i32, i32, i32) {
    %c0_i32 = arith.constant 0 : i32
    %c0_i32_0 = arith.constant 0 : i32
    %c0_i32_1 = arith.constant 0 : i32
    return %arg0, %c0_i32, %arg1, %c0_i32_0 : i32, i32, i32, i32
  }
}

</mosaic_0001>

<bundles_post_ra>
// kernel: mosaic_cfa_bias_forward.1
= control target key start
LH: loop header
LB: loop body
LE: loop exit
PB: predicated region body
PF: predicated region fallthrough
CT: control target
= control target key end

     0   :  { %s364_s9 = smov 0   ;;  %s366_s10 = smov 0   ;;  %s403_s0 = inlined_call_operand.vmem [shape: f32[2,3,8,128], index: 0, kind: input, shape index: {}]   ;;  %s404_s1 = inlined_call_operand.vmem [shape: f32[3,1,128], index: 1, kind: input, shape index: {}]   ;;  %s405_s2 = inlined_call_operand.vmem [shape: f32[2,1,8,128], index: 2, kind: output, shape index: {}]  }
   0x1   :  { %s368_s11 = smov 0  }
   0x2 LB: > { %s24_s12 = sadd.s32 1, %s343_s10  ;;  %p288_p0 = scmp.ge.s32.totalorder %s347_s11, 1  ;;  %s347_s11 = sphi %s368_s11, %s12_s11   ;;  %s343_s10 = sphi %s366_s10, %s407_s10   ;;  %s339_s9 = sphi %s364_s9, %s406_s9  }
   0x3   : > { %p26_p1 = scmp.ge.s32.totalorder %s24_s12, 2  ;;  %p131_p2 = scmp.lt.s32.totalorder %s347_s11, 3 }
   0x5   : > { %s409_s12 = smov (%p26_p1, %s24_s12), 0  ;;  %p132_p3 = pnand %p288_p0, %p131_p2 }
   0x6   : > { %p158_p4 = scmp.lt.s32.totalorder (!%p132_p3), %s339_s9, 1 }
   0x7   : > { %135 = sbr.rel (%p132_p3) target bundleno = 24 (0x18), region = 28 }
   0xc   : > { %s411_s9 = smov (!%p158_p4, %s339_s9), 1  ;;  %v291_v0 = vld [vmem:[%s404_s1] ss:$0 sm:$0xff]  ;;  %v294_v1 = vld [vmem:[%s404_s1 + $0x1] ss:$0 sm:$0xff] }
   0xd   : > { %s300_s13 = smul.u32 24, %s411_s9  ;;  %v297_v2 = vld [vmem:[%s404_s1 + $0x2] ss:$0 sm:$0xff]  ;;  %s290_s23 = sshll.u32 %s411_s9, 3 }
   0xe   : > { %s172_s26 = scalar_lea.vmem %s405_s2, %s290_s23 }
   0xf   : > { %s165_s22 = scalar_lea.vmem %s403_s0, %s300_s13 }
  0x10   : > { %v173_v3 = vld [vmem:[%s165_s22] sm:$0xff]  ;;  %v292_v4 = vld [vmem:[%s165_s22 + $0x8] sm:$0xff]  ;;  %v295_v5 = vld [vmem:[%s165_s22 + $0x10] sm:$0xff] }
  0x11   : > { %v181_v6 = vmul.f32 %v291_v0, %v173_v3  ;;  %v192_v7 = vmul.f32 %v294_v1, %v292_v4  ;;  %v204_v8 = vmul.f32 %v297_v2, %v295_v5 }
  0x13   : > { %v193_v9 = vadd.f32 %v192_v7, %v181_v6 }
  0x15   : > { %v205_v10 = vadd.f32 %v204_v8, %v193_v9 }
  0x17   : > { %206 = vst [vmem:[%s172_s26] sm:$0xff] %v205_v10 }
  0x18 PF: > { %s12_s11 = sadd.s32 1, %s347_s11   ;;  %s406_s9 = smov %s343_s10 }
  0x19   : > { %p9_p5 = scmp.ge.s32.totalorder %s12_s11, 4   ;;  %s407_s10 = smov %s409_s12 }
  0x1b   :  { %11 = sbr.rel (!%p9_p5) target bundleno = 2 (0x2), region = 62 }

</bundles_post_ra>
